<compile_context>
chip_gen: v5e
topology: v5e:2x2
jax: 0.10.0
libtpu: 0.0.40
codegen_flags: <defaults>
</compile_context>

<pallas_src>
import jax
import jax.numpy as jnp
from jax.experimental import pallas as pl
from jax.experimental.pallas import tpu as pltpu


def _round_up(x, m):
    return ((x + m - 1) // m) * m


# ---------------------------------------------------------------------------
# Kernel: one (tm x tn) logit block per grid step.
#   o = (h.astype(bf16) @ w_packed) + b       (full-K contraction, no K axis)
# ---------------------------------------------------------------------------
def output_layer_kernel(h_ref, w_ref, b_ref, o_ref):
    # Fuse the activation bf16 cast into the kernel (no extra wrapper-side
    # HBM cast/pad pass). If h is already bf16 this cast is a no-op.
    h = h_ref[...].astype(jnp.bfloat16)
    o_ref[...] = (
        jnp.dot(h, w_ref[...], preferred_element_type=jnp.float32) + b_ref[...]
    )


# ---------------------------------------------------------------------------
# One-time parameter packing (run when params are created/updated, NOT per
# forward call).
#   w_packed[h*L + l, v] = w_stack[l, v, h]   -> matches h_all.reshape(M, H*L)
# ---------------------------------------------------------------------------
def pack_output_params(w_stack, b_y):
    L, V, H = w_stack.shape
    K = H * L
    Vp = _round_up(V, 128)
    w = jnp.transpose(w_stack, (2, 0, 1)).reshape(K, V).astype(jnp.bfloat16)
    b = b_y.reshape(1, V).astype(jnp.float32)
    if Vp != V:
        w = jnp.pad(w, ((0, 0), (0, Vp - V)))
        b = jnp.pad(b, ((0, 0), (0, Vp - V)))
    return w, b


def output_layer(h_all, w_packed, b_packed, vocab_size, *, tm=512, tn=2048,
                 vmem_budget_bytes=40 * 1024 * 1024):
    """
    h_all:    (B, T, H, L)   float32 or bfloat16 (PyTorch layout; no copy made)
    w_packed: (K=H*L, Vp)    bfloat16  from pack_output_params
    b_packed: (1, Vp)        float32   from pack_output_params
    returns:  (B, T, vocab_size) float32
    """
    B, T, H, L = h_all.shape
    M = B * T
    K = H * L
    Kw, Vp = w_packed.shape
    assert Kw == K and Vp % 128 == 0 and Vp >= vocab_size

    # Contiguous view: no activation transpose / cast / pad in the wrapper.
    h = h_all.reshape(M, K)

    # ---- tile sizing (full K per step; only M and V are tiled) --------------
    if tm >= M:
        tm = M                                  # full-extent M block
    else:
        tm = max(16, (tm // 16) * 16)           # bf16 LHS: 16 rows / vreg
    tn = max(128, (min(tn, Vp) // 128) * 128)   # lane-dense output tiles

    h_bytes = h.dtype.itemsize

    def vmem_bytes(tm_, tn_):
        # double-buffered h, w, out blocks + bias row
        return (2 * tm_ * K * h_bytes) + (2 * K * tn_ * 2) \
            + (2 * tm_ * tn_ * 4) + (2 * tn_ * 4)

    # Shrink tiles until the working set fits the VMEM budget (v7x-safe).
    while vmem_bytes(tm, tn) > vmem_budget_bytes:
        if tn > 512:
            tn = max(512, ((tn // 2) // 128) * 128)
        elif tm > 16:
            tm = max(16, ((tm // 2) // 16) * 16)
        elif tn > 128:
            tn = max(128, ((tn // 2) // 128) * 128)
        else:
            break

    grid = (pl.cdiv(M, tm), pl.cdiv(Vp, tn))

    out = pl.pallas_call(
        output_layer_kernel,
        out_shape=jax.ShapeDtypeStruct((M, Vp), jnp.float32),
        grid_spec=pltpu.PrefetchScalarGridSpec(
            num_scalar_prefetch=0,
            grid=grid,
            in_specs=[
                pl.BlockSpec((tm, K), lambda i, j: (i, 0)),   # activations (full K)
                pl.BlockSpec((K, tn), lambda i, j: (0, j)),   # packed weights
                pl.BlockSpec((1, tn), lambda i, j: (0, j)),   # bias row
            ],
            out_specs=pl.BlockSpec((tm, tn), lambda i, j: (i, j)),
        ),
        compiler_params=pltpu.CompilerParams(
            # No reduction axis left: both grid axes are independent.
            dimension_semantics=("parallel", "parallel"),
            # Safe on v5e/v6e (128 MiB) and within v7x's 64 MiB.
            vmem_limit_bytes=48 * 1024 * 1024,
        ),
    )(h, w_packed, b_packed)

    return out[:, :vocab_size].reshape(B, T, vocab_size)


def output_layer_ref(h_all, w_stack, b_y):
    # Pure-JAX f32 reference mirroring the PyTorch forward.
    L = h_all.shape[-1]
    logits = b_y
    for n in range(L):
        h_n = h_all[:, :, :, n]                       # (B, T, H)
        logits = jnp.einsum("bth,vh->btv", h_n, w_stack[n]) + logits
    return logits


if __name__ == "__main__":
    # Small shapes consistent with the module's forward.
    B, T = 2, 8
    n_hidden = 32
    vocab_size = 65       # non-multiple of 128 -> exercises the Vp padding path
    num_layers = 2        # exercises the layer-sum fold into K

    key = jax.random.PRNGKey(0)
    k_h, k_w = jax.random.split(key)

    h_all = jax.random.normal(k_h, (B, T, n_hidden, num_layers), dtype=jnp.float32)
    # Deterministic nn.Linear-like init; b_y initialized to zeros (as in module).
    w_stack = jax.random.normal(
        k_w, (num_layers, vocab_size, n_hidden), dtype=jnp.float32
    ) * (1.0 / jnp.sqrt(n_hidden))
    b_y = jnp.zeros((vocab_size,), dtype=jnp.float32)

    # One-time parameter packing (outside the per-step hot path).
    w_packed, b_packed = pack_output_params(w_stack, b_y)

    out = output_layer(h_all, w_packed, b_packed, vocab_size)
    out = jax.block_until_ready(out)

    ref = output_layer_ref(h_all, w_stack, b_y)
    assert out.shape == (B, T, vocab_size)
    # bf16 operands with f32 accumulation -> loosened tolerance vs f32 reference.
    assert jnp.allclose(out, ref, atol=5e-2, rtol=5e-2), (
        float(jnp.max(jnp.abs(out - ref)))
    )

    print("KERNEL_OK")
</pallas_src>

<mosaic_0001>
module attributes {stable_mosaic.version = 11 : i64} {
  func.func @output_layer_kernel(%arg0: i32, %arg1: i32, %arg2: memref<16x64xf32, #tpu.memory_space<vmem>>, %arg3: memref<64x128xbf16, #tpu.memory_space<vmem>>, %arg4: memref<1x128xf32, #tpu.memory_space<vmem>>, %arg5: memref<16x128xf32, #tpu.memory_space<vmem>>) attributes {dimension_semantics = [#tpu.dimension_semantics<parallel>, #tpu.dimension_semantics<parallel>], iteration_bounds = array<i64: 1, 1>, scalar_prefetch = 0 : i64, scratch_operands = 0 : i64, tpu.core_type = #tpu.core_type<tc>, window_params = [{transform_indices = @transform_0, window_bounds = array<i64: 16, 64>}, {transform_indices = @transform_1, window_bounds = array<i64: 64, 128>}, {transform_indices = @transform_2, window_bounds = array<i64: 1, 128>}, {transform_indices = @transform_3, window_bounds = array<i64: 16, 128>}]} {
    %c0 = arith.constant 0 : index
    %c0_0 = arith.constant 0 : index
    %0 = vector.load %arg2[%c0, %c0_0] : memref<16x64xf32, #tpu.memory_space<vmem>>, vector<16x64xf32>
    %1 = arith.truncf %0 : vector<16x64xf32> to vector<16x64xbf16>
    %c0_1 = arith.constant 0 : index
    %c0_2 = arith.constant 0 : index
    %2 = vector.load %arg3[%c0_1, %c0_2] : memref<64x128xbf16, #tpu.memory_space<vmem>>, vector<64x128xbf16>
    %cst = arith.constant dense<0.000000e+00> : vector<16x128xf32>
    %3 = tpu.matmul %1, %2, %cst {dimension_numbers = #tpu.dot_dimension_numbers<[1], [0], [0], [1], [0, 0, 1, 1], [], []>} : vector<16x64xbf16>, vector<64x128xbf16>, vector<16x128xf32> -> vector<16x128xf32>
    %c0_3 = arith.constant 0 : index
    %c0_4 = arith.constant 0 : index
    %4 = vector.load %arg4[%c0_3, %c0_4] : memref<1x128xf32, #tpu.memory_space<vmem>>, vector<1x128xf32>
    %5 = vector.broadcast %4 : vector<1x128xf32> to vector<16x128xf32>
    %6 = arith.addf %3, %5 : vector<16x128xf32>
    %c0_5 = arith.constant 0 : index
    %c0_6 = arith.constant 0 : index
    %7 = vector.load %arg5[%c0_5, %c0_6] : memref<16x128xf32, #tpu.memory_space<vmem>>, vector<16x128xf32>
    tpu.vector_store %arg5[%c0_5, %c0_6], %6 {strides = array<i32>} : memref<16x128xf32, #tpu.memory_space<vmem>>, vector<16x128xf32>,
    return
  }
  func.func @transform_0(%arg0: i32, %arg1: i32) -> (i32, i32) {
    %c0_i32 = arith.constant 0 : i32
    %c0_i32_0 = arith.constant 0 : i32
    return %arg0, %c0_i32 : i32, i32
  }
  func.func @transform_1(%arg0: i32, %arg1: i32) -> (i32, i32) {
    %c0_i32 = arith.constant 0 : i32
    %c0_i32_0 = arith.constant 0 : i32
    return %c0_i32, %arg1 : i32, i32
  }
  func.func @transform_2(%arg0: i32, %arg1: i32) -> (i32, i32) {
    %c0_i32 = arith.constant 0 : i32
    %c0_i32_0 = arith.constant 0 : i32
    return %c0_i32, %arg1 : i32, i32
  }
  func.func @transform_3(%arg0: i32, %arg1: i32) -> (i32, i32) {
    %c0_i32 = arith.constant 0 : i32
    return %arg0, %arg1 : i32, i32
  }
}

</mosaic_0001>

<bundles_post_ra>
// kernel: tpu_custom_call.1
= control target key start
LH: loop header
LB: loop body
LE: loop exit
PB: predicated region body
PF: predicated region fallthrough
CT: control target
= control target key end

     0   :  { %8 = vsyncpa [#allocation3], 0  ;;  %s279_s0 = inlined_call_operand.hbm [shape: f32[16,64], index: 0, kind: input, shape index: {}]   ;;  %s280_s1 = inlined_call_operand.hbm [shape: bf16[64,128], index: 1, kind: input, shape index: {}]   ;;  %s281_s2 = inlined_call_operand.vmem [shape: f32[1,128], index: 2, kind: input, shape index: {}]   ;;  %s282_s3 = inlined_call_operand.hbm [shape: f32[16,128], index: 3, kind: output, shape index: {}]  }
   0x1   :  { %9 = vsyncpa [#allocation6], 0 }
   0x2   :  { %10 = vsyncpa [#allocation4], 0  ;;  %s15_s14 = sshll.u32 %s279_s0, 4  ;;  %s234_s15 = smov [#allocation2]   ;;  %s16_s14 = int_to_ptr.hbm [resolvable:$true] %s15_s14 }
   0x3   :  { %s17_s16 = sshll.u32 %s234_s15, 4  ;;  %s28_s19 = sshll.u32 %s280_s1, 4  ;;  %s18_s16 = int_to_ptr.vmem [resolvable:$true] %s17_s16  ;;  %s29_s19 = int_to_ptr.hbm [resolvable:$true] %s28_s19 }
   0x4   :  { %s235_s20 = smov 128   ;;  %s236_s21 = smov 8  }
   0x5   :  { %23 = dma.hbm_to_vmem [thread:$0]  %s16_s14, 256, %s18_s16, [#allocation3], %s235_s20, %s235_s20, %s236_s21  }
   0x6   :  { %s237_s22 = smov [#allocation5]   ;;  %s238_s24 = smov 64  }
   0x7   :  { %s30_s23 = sshll.u32 %s237_s22, 4  ;;  %s239_s0 = smov 4   ;;  %s31_s23 = int_to_ptr.vmem [resolvable:$true] %s30_s23 }
   0x8   :  { %36 = dma.hbm_to_vmem [thread:$0]  %s29_s19, 512, %s31_s23, [#allocation6], %s238_s24, %s238_s24, %s239_s0  }
   0x9   :  { %228 = dma.done.wait [#allocation3], 256  }
   0xa   :  { %229 = vsyncadd [#allocation3], 4294967040 }
   0xb   :  { %230 = dma.done.wait [#allocation6], 512  }
   0xc   :  { %231 = vsyncadd [#allocation6], 4294966784  ;;  %v147_v0 = vld [vmem:[#allocation5 + $0x18] sm:$0xff]  ;;  %v146_v1 = vld [vmem:[#allocation5 + $0x10] sm:$0xff]  ;;  %vm87_vm0 = vcmask 523264   ;;  %s240_s26 = smov [#allocation7]  }
   0xd   :  { %95 = vmatpush.bf16.msra.mxu0 %v147_v0  ;;  %v145_v2 = vld [vmem:[#allocation5 + $0x8] sm:$0xff]  ;;  %v144_v3 = vld [vmem:[#allocation5] sm:$0xff]  ;;  %v48_v4 = vld [vmem:[#allocation2] sm:$0xff]  ;;  %s111_s27 = sshll.u32 %s240_s26, 4  ;;  %s113_s30 = sshll.u32 %s282_s3, 4  ;;  %s112_s27 = int_to_ptr.vmem [resolvable:$true] %s111_s27  ;;  %s114_s30 = int_to_ptr.hbm [resolvable:$true] %s113_s30 }
   0xe   :  { %v49_v5 = vld [vmem:[#allocation2 + $0x8] sm:$0xff]  ;;  %v155_v7 = vld [vmem:[%s281_s2] ss:$0 sm:$0xff] }
   0xf   :  { %v50_v6 = vpack.c.bf16 %v49_v5, %v48_v4 }
  0x11   :  { %96 = vmatpush.bf16.msra.mxu0 %v146_v1 }
  0x15   :  { %97 = vmatpush.bf16.msra.mxu0 %v145_v2 }
  0x19   :  { %98 = vmatpush.bf16.msra.mxu0 %v144_v3 }
  0x1c   :  { %143 = vmatmul.msk.bf16.vlgmr.msra.gmra.mxu0 %vm87_vm0, %v50_v6 }
  0x99   :  { %v100_v8 = vpop.f32.mrf.mxu0 }
  0x9a   :  { %v101_v9 = vadd.f32 %v155_v7, %v100_v8 }
  0x9c   :  { %105 = vst [vmem:[#allocation7] sm:$0xff] %v101_v9 }
  0xa1   :  { %v102_v10 = vpop.f32.mrf.mxu0 }
  0xa2   :  { %v103_v11 = vadd.f32 %v155_v7, %v102_v10 }
  0xa4   :  { %106 = vst [vmem:[#allocation7 + $0x8] sm:$0xff] %v103_v11 }
  0xa5   :  { %119 = dma.vmem_to_hbm [thread:$0]  %s112_s27, 256, %s114_s30, [#allocation4], %s235_s20, %s235_s20, %s236_s21  }
  0xa6   :  { %232 = dma.done.wait [#allocation4], 256  }
  0xa7   :  { %233 = vsyncadd [#allocation4], 4294967040 }
  0xa8   :  { %124 = vsyncpa [#allocation3], 1 }
  0xa9   :  { %125 = vsyncpa [#allocation6], 1 }
  0xaa   :  { %126 = vsyncpa [#allocation4], 1 }

</bundles_post_ra>
